<compile_context>
chip_gen: v7x
topology: tpu7x:2x2x1
jax: 0.10.0
libtpu: 0.0.40
codegen_flags: <defaults>
</compile_context>

<pallas_src>
import math

import jax
import jax.numpy as jnp
from jax import lax
from jax.experimental import pallas as pl
from jax.experimental.pallas import tpu as pltpu


def _upsample1d_kernel(x_ref, w_ref, b_ref, o_ref):
    """One batch-block.

    x_ref: (Bblk, L+2, C)  channels-last input with a 1-row zero halo on each
                           side of L (emulates the transposed-conv zero pad).
    w_ref: (3C, 2C)        fused weight:
                             rows [0:C]   (applied to x[m-1]) : [w3 | 0 ]
                             rows [C:2C]  (applied to x[m]  ) : [w1 | w2]
                             rows [2C:3C] (applied to x[m+1]) : [0  | w0]
    b_ref: (1, 2C)         bias duplicated for the even/odd halves.
    o_ref: (Bblk, L, 2C)   output slab [even | odd]; wrapper interleaves.
    """
    Bblk, Lp2, C = x_ref.shape
    L = Lp2 - 2
    x = x_ref[...]

    # Static halo slices — no O(L^2) shift matmuls, no roll/mask.
    x_prev = x[:, 0:L, :]        # x[m-1]  (zero row at m=0 comes from the halo)
    x_mid = x[:, 1:L + 1, :]     # x[m]
    x_next = x[:, 2:L + 2, :]    # x[m+1]  (zero row at m=L-1 from the halo)

    # One fused MXU contraction over all rows of this batch block:
    #   (Bblk*L, 3C) @ (3C, 2C) -> (Bblk*L, 2C)
    xcat = jnp.concatenate([x_prev, x_mid, x_next], axis=-1)
    xcat = xcat.reshape(Bblk * L, 3 * C)
    acc = jnp.dot(xcat, w_ref[...], preferred_element_type=jnp.float32)
    acc = acc + b_ref[...]

    o_ref[...] = acc.reshape(Bblk, L, 2 * C).astype(o_ref.dtype)


def upsample1d(x: jax.Array, weight: jax.Array, bias: jax.Array) -> jax.Array:
    """ConvTranspose1d(dim, dim, 4, stride=2, padding=1) forward.

    x:      (B, C, L)  float, PyTorch NCW layout
    weight: (C, C, 4)  PyTorch ConvTranspose1d weight layout (in, out, k)
    bias:   (C,)
    returns (B, C, 2L) float32
    """
    B, C, L = x.shape
    Cin, Cout, K = weight.shape
    assert (Cin, Cout, K) == (C, C, 4), "expected ConvTranspose1d(dim, dim, 4)"
    assert L >= 2, "need at least 2 timesteps"

    # --- layout plumbing in plain JAX (tiny; fuses with adjacent XLA ops) ---
    x_t = jnp.transpose(x, (0, 2, 1)).astype(jnp.float32)          # (B, L, C)
    x_pad = jnp.pad(x_t, ((0, 0), (1, 1), (0, 0)))                 # (B, L+2, C) halo

    w = weight.astype(jnp.float32)
    w0, w1, w2, w3 = w[..., 0], w[..., 1], w[..., 2], w[..., 3]
    zeros = jnp.zeros((C, C), jnp.float32)
    w_fused = jnp.concatenate([
        jnp.concatenate([w3, zeros], axis=1),   # x[m-1] rows
        jnp.concatenate([w1, w2], axis=1),      # x[m]   rows
        jnp.concatenate([zeros, w0], axis=1),   # x[m+1] rows
    ], axis=0)                                                     # (3C, 2C)
    b2 = jnp.concatenate([bias, bias]).reshape(1, 2 * C).astype(jnp.float32)

    # Batch-block sizing: target >=256 sublane rows per step (fills the MXU on
    # v6e/v7x), capped at B; pick a divisor of B so the grid tiles evenly.
    bblk = min(B, max(1, (256 + L - 1) // L))
    while B % bblk:
        bblk -= 1
    grid = (B // bblk,)

    out = pl.pallas_call(
        _upsample1d_kernel,
        out_shape=jax.ShapeDtypeStruct((B, L, 2 * C), jnp.float32),
        grid_spec=pltpu.PrefetchScalarGridSpec(
            num_scalar_prefetch=0,
            grid=grid,
            in_specs=[
                pl.BlockSpec((bblk, L + 2, C), lambda b: (b, 0, 0)),   # batch block
                pl.BlockSpec((3 * C, 2 * C), lambda b: (0, 0)),        # resident weight
                pl.BlockSpec((1, 2 * C), lambda b: (0, 0)),            # resident bias
            ],
            out_specs=pl.BlockSpec((bblk, L, 2 * C), lambda b: (b, 0, 0)),
        ),
        compiler_params=pltpu.CompilerParams(
            dimension_semantics=("arbitrary",)),
    )(x_pad, w_fused, b2)

    # (B, L, 2C) -> (B, 2L, C): row-major reshape interleaves even/odd outputs.
    out = out.reshape(B, 2 * L, C)
    # Back to PyTorch NCW layout.
    return jnp.transpose(out, (0, 2, 1))


def _reference(x: jax.Array, weight: jax.Array, bias: jax.Array) -> jax.Array:
    """Pure-JAX ConvTranspose1d reference (independent of the kernel's decomposition)."""
    K = weight.shape[-1]
    pad = 1
    w_f = jnp.flip(weight, axis=-1)              # flip kernel taps
    w_f = jnp.transpose(w_f, (1, 0, 2))          # (C_out, C_in, K)
    out = lax.conv_general_dilated(
        x.astype(jnp.float32), w_f.astype(jnp.float32),
        window_strides=(1,),
        padding=[(K - 1 - pad, K - 1 - pad)],
        lhs_dilation=(2,),
        rhs_dilation=(1,),
        dimension_numbers=("NCH", "OIH", "NCH"),
        precision=lax.Precision.HIGHEST)
    return out + bias.astype(jnp.float32)[None, :, None]


if __name__ == "__main__":
    key = jax.random.PRNGKey(0)
    k1, k2, k3 = jax.random.split(key, 3)

    B, C, L = 2, 32, 16                              # dim=32 channels, 16 timesteps
    x = jax.random.normal(k1, (B, C, L), dtype=jnp.float32)
    weight = jax.random.normal(k2, (C, C, 4), dtype=jnp.float32) / math.sqrt(C * 4)
    bias = 0.1 * jax.random.normal(k3, (C,), dtype=jnp.float32)

    out = upsample1d(x, weight, bias)
    out = jax.block_until_ready(out)

    ref = _reference(x, weight, bias)
    assert out.shape == (B, C, 2 * L), out.shape
    assert out.dtype == jnp.float32, out.dtype
    max_err = float(jnp.max(jnp.abs(out - ref)))
    assert jnp.allclose(out, ref, atol=1e-3, rtol=1e-3), f"mismatch vs reference, max abs err={max_err}"

    print("KERNEL_OK")
</pallas_src>

<mosaic_0001>
module attributes {stable_mosaic.version = 11 : i64} {
  func.func @_upsample1d_kernel(%arg0: i32, %arg1: memref<2x18x32xf32, #tpu.memory_space<vmem>>, %arg2: memref<96x64xf32, #tpu.memory_space<vmem>>, %arg3: memref<1x64xf32, #tpu.memory_space<vmem>>, %arg4: memref<2x16x64xf32, #tpu.memory_space<vmem>>) attributes {dimension_semantics = [#tpu.dimension_semantics<arbitrary>], iteration_bounds = array<i64: 1>, scalar_prefetch = 0 : i64, scratch_operands = 0 : i64, tpu.core_type = #tpu.core_type<tc>, window_params = [{transform_indices = @transform_0, window_bounds = array<i64: 2, 18, 32>}, {pipeline_mode = #tpu.pipeline_mode<synchronous>, transform_indices = @transform_1, window_bounds = array<i64: 96, 64>}, {pipeline_mode = #tpu.pipeline_mode<synchronous>, transform_indices = @transform_2, window_bounds = array<i64: 1, 64>}, {transform_indices = @transform_3, window_bounds = array<i64: 2, 16, 64>}]} {
    %c0 = arith.constant 0 : index
    %c0_0 = arith.constant 0 : index
    %c0_1 = arith.constant 0 : index
    %0 = vector.load %arg1[%c0, %c0_0, %c0_1] : memref<2x18x32xf32, #tpu.memory_space<vmem>>, vector<2x18x32xf32>
    %1 = vector.extract_strided_slice %0 {offsets = [0, 0, 0], sizes = [2, 16, 32], strides = [1, 1, 1]} : vector<2x18x32xf32> to vector<2x16x32xf32>
    %2 = vector.extract_strided_slice %0 {offsets = [0, 1, 0], sizes = [2, 16, 32], strides = [1, 1, 1]} : vector<2x18x32xf32> to vector<2x16x32xf32>
    %3 = vector.extract_strided_slice %0 {offsets = [0, 2, 0], sizes = [2, 16, 32], strides = [1, 1, 1]} : vector<2x18x32xf32> to vector<2x16x32xf32>
    %4 = tpu.concatenate %1, %2, %3 in 2 : vector<2x16x32xf32>, vector<2x16x32xf32>, vector<2x16x32xf32> -> vector<2x16x96xf32>
    %5 = vector.shape_cast %4 : vector<2x16x96xf32> to vector<32x96xf32>
    %c0_2 = arith.constant 0 : index
    %c0_3 = arith.constant 0 : index
    %6 = vector.load %arg2[%c0_2, %c0_3] : memref<96x64xf32, #tpu.memory_space<vmem>>, vector<96x64xf32>
    %cst = arith.constant dense<0.000000e+00> : vector<32x64xf32>
    %7 = tpu.matmul %5, %6, %cst {dimension_numbers = #tpu.dot_dimension_numbers<[1], [0], [0], [1], [0, 0, 1, 1], [], []>} : vector<32x96xf32>, vector<96x64xf32>, vector<32x64xf32> -> vector<32x64xf32>
    %c0_4 = arith.constant 0 : index
    %c0_5 = arith.constant 0 : index
    %8 = vector.load %arg3[%c0_4, %c0_5] : memref<1x64xf32, #tpu.memory_space<vmem>>, vector<1x64xf32>
    %9 = vector.broadcast %8 : vector<1x64xf32> to vector<32x64xf32>
    %10 = arith.addf %7, %9 : vector<32x64xf32>
    %11 = vector.shape_cast %10 : vector<32x64xf32> to vector<2x16x64xf32>
    %c0_6 = arith.constant 0 : index
    %c0_7 = arith.constant 0 : index
    %c0_8 = arith.constant 0 : index
    %12 = vector.load %arg4[%c0_6, %c0_7, %c0_8] : memref<2x16x64xf32, #tpu.memory_space<vmem>>, vector<2x16x64xf32>
    tpu.vector_store %arg4[%c0_6, %c0_7, %c0_8], %11 {strides = array<i32>} : memref<2x16x64xf32, #tpu.memory_space<vmem>>, vector<2x16x64xf32>,
    return
  }
  func.func @transform_0(%arg0: i32) -> (i32, i32, i32) {
    %c0_i32 = arith.constant 0 : i32
    %c0_i32_0 = arith.constant 0 : i32
    %c0_i32_1 = arith.constant 0 : i32
    return %arg0, %c0_i32, %c0_i32_0 : i32, i32, i32
  }
  func.func @transform_1(%arg0: i32) -> (i32, i32) {
    %c0_i32 = arith.constant 0 : i32
    %c0_i32_0 = arith.constant 0 : i32
    %c0_i32_1 = arith.constant 0 : i32
    return %c0_i32, %c0_i32_0 : i32, i32
  }
  func.func @transform_2(%arg0: i32) -> (i32, i32) {
    %c0_i32 = arith.constant 0 : i32
    %c0_i32_0 = arith.constant 0 : i32
    %c0_i32_1 = arith.constant 0 : i32
    return %c0_i32, %c0_i32_0 : i32, i32
  }
  func.func @transform_3(%arg0: i32) -> (i32, i32, i32) {
    %c0_i32 = arith.constant 0 : i32
    %c0_i32_0 = arith.constant 0 : i32
    %c0_i32_1 = arith.constant 0 : i32
    return %arg0, %c0_i32, %c0_i32_0 : i32, i32, i32
  }
}

</mosaic_0001>

<bundles_post_ra>
// kernel: tpu_custom_call.1
= control target key start
LH: loop header
LB: loop body
LE: loop exit
PB: predicated region body
PF: predicated region fallthrough
CT: control target
= control target key end

     0   :  { %vm27_vm0 = vcmask 1046528   ;;  %vm50_vm1 = vcmask 1045504   ;;  %s470_s0 = inlined_call_operand.vmem [shape: f32[2,18,32], index: 0, kind: input, shape index: {}]   ;;  %s471_s1 = inlined_call_operand.vmem [shape: f32[96,64], index: 1, kind: input, shape index: {}]   ;;  %s472_s2 = inlined_call_operand.vmem [shape: f32[1,64], index: 2, kind: input, shape index: {}]   ;;  %s473_s3 = inlined_call_operand.hbm [shape: f32[2,16,64], index: 3, kind: output, shape index: {}]  }
   0x1   :  { %v364_v0 = vld [vmem:[%s470_s0 + $0x8] sm:$0xff]  ;;  %v17_v1 = vld [vmem:[%s470_s0 + $0x10] sm:$0x3]  ;;  %v372_v2 = vld [vmem:[%s470_s0] sm:$0xff] }
   0x2   :  { %v29_v3 = vrot.slane %v364_v0, 1  ;;  %v31_v4 = vrot.slane %v17_v1, 1  ;;  %v28_v5 = vrot.slane %v372_v2, 1  ;;  %v379_v6 = vld [vmem:[%s470_s0 + $0x20] sm:$0xff]  ;;  %v20_v7 = vld [vmem:[%s470_s0 + $0x28] sm:$0x3] }
   0x3   :  { %v34_v8 = vrot.slane %v379_v6, 1  ;;  %v36_v9 = vrot.slane %v20_v7, 1  ;;  %v388_v10 = vld [vmem:[%s470_s0 + $0x18] sm:$0xff]  ;;  %v83_v14 = vld [vmem:[%s471_s1] sm:$0xff]  ;;  %v84_v15 = vld [vmem:[%s471_s1 + $0x8] sm:$0xff]  ;;  %s336_s0 = smov 32  }
   0x4   :  { %v32_v11 = vsel %vm27_vm0, %v29_v3, %v31_v4  ;;  %v30_v12 = vsel %vm27_vm0, %v28_v5, %v29_v3  ;;  %v33_v13 = vrot.slane %v388_v10, 1  ;;  %v85_v16 = vld [vmem:[%s471_s1 + $0x10] sm:$0xff]  ;;  %v56_v18 = vrot.slane %v388_v10, 2  ;;  %v86_v20 = vld [vmem:[%s471_s1 + $0x18] sm:$0xff]  ;;  %v87_v26 = vld [vmem:[%s471_s1 + $0x20] sm:$0xff] }
   0x5   :  { %40 = vrot.lane.b32.xlu1 %v32_v11, %s336_s0  ;;  %38 = vrot.lane.b32.xlu0 %v30_v12, %s336_s0  ;;  %v37_v17 = vsel %vm27_vm0, %v34_v8, %v36_v9  ;;  %v57_v19 = vrot.slane %v379_v6, 2  ;;  %v51_v22 = vrot.slane %v372_v2, 2  ;;  %v52_v23 = vrot.slane %v364_v0, 2  ;;  %v88_v27 = vld [vmem:[%s471_s1 + $0x28] sm:$0xff] }
   0x6   :  { %v35_v21 = vsel %vm27_vm0, %v33_v13, %v34_v8  ;;  %v271_v24 = vpack.c.bf16 %v84_v15, %v83_v14  ;;  %v275_v25 = vpack.c.bf16 %v86_v20, %v85_v16 }
   0x8   :  { %272 = vmatprep.subr.bf16.mxu0 %v271_v24  ;;  %295 = vmatprep.subr.bf16.mxu1 %v271_v24 }
   0x9   :  { %8 = vsyncpa [#allocation3], 0  ;;  %44 = vrot.lane.b32.xlu1 %v37_v17, %s336_s0  ;;  %42 = vrot.lane.b32.xlu0 %v35_v21, %s336_s0  ;;  %v58_v28 = vsel %vm50_vm1, %v56_v18, %v57_v19  ;;  %v53_v29 = vsel %vm50_vm1, %v51_v22, %v52_v23  ;;  %v59_v30 = vrot.slane %v20_v7, 2  ;;  %v54_v31 = vrot.slane %v17_v1, 2  ;;  %v89_v33 = vld [vmem:[%s471_s1 + $0x30] sm:$0xff]  ;;  %v90_v34 = vld [vmem:[%s471_s1 + $0x38] sm:$0xff] }
   0xa   :  { %274 = vmatpush3.bf16.msra.mxu0 %v271_v24  ;;  %301 = vmatpush3.bf16.msra.mxu1 %v271_v24  ;;  %v279_v32 = vpack.c.bf16 %v88_v27, %v87_v26  ;;  %s337_s13 = smov 64   ;;  %v283_v37 = vpack.c.bf16 %v90_v34, %v89_v33  ;;  %v91_v38 = vld [vmem:[%s471_s1 + $0x40] sm:$0xff]  ;;  %v92_v39 = vld [vmem:[%s471_s1 + $0x48] sm:$0xff]  ;;  %v93_v41 = vld [vmem:[%s471_s1 + $0x50] sm:$0xff]  ;;  %vm73_vm2 = vcmask 261120   ;;  %vm78_vm3 = vcmask 523264  }
   0xb   :  { %276 = vmatprep.subr.bf16.mxu0 %v275_v25  ;;  %296 = vmatprep.subr.bf16.mxu1 %v275_v25  ;;  %v60_v35 = vsel %vm50_vm1, %v57_v19, %v59_v30  ;;  %v55_v36 = vsel %vm50_vm1, %v52_v23, %v54_v31  ;;  %v287_v40 = vpack.c.bf16 %v92_v39, %v91_v38  ;;  %v94_v42 = vld [vmem:[%s471_s1 + $0x58] sm:$0xff]  ;;  %vm102_vm4 = vcmask 785408   ;;  %v220_v60 = vld [vmem:[%s472_s2] ss:$0 sm:$0xff]  ;;  %s338_s23 = smov [#allocation2]  }
   0xc   :  { %v291_v43 = vpack.c.bf16 %v94_v42, %v93_v41  ;;  %s209_s24 = sshll.u32 %s338_s23, 4  ;;  %s210_s24 = int_to_ptr.vmem [resolvable:$true] %s209_s24 }
   0xd   :  { %65 = vrot.lane.b32.xlu1 %v58_v28, %s337_s13  ;;  %61 = vrot.lane.b32.xlu0 %v53_v29, %s337_s13  ;;  %s312_s2 = scalar_lea.vmem %s210_s24, 512  ;;  %p317_p1 = scmp.lt.s32.totalorder %s210_s24, %s210_s24 }
   0xe   :  { %278 = vmatpush3.bf16.msra.mxu0 %v275_v25  ;;  %302 = vmatpush3.bf16.msra.mxu1 %v275_v25  ;;  %p313_p0 = scmp.ne.s32.totalorder %s210_s24, %s312_s2  ;;  %p318_p2 = scmp.lt.s32.totalorder %s312_s2, %s312_s2 }
   0xf   :  { %280 = vmatprep.subr.bf16.mxu0 %v279_v32  ;;  %297 = vmatprep.subr.bf16.mxu1 %v279_v32 }
  0x10   :  { %p319_p3 = por %p318_p2, %p317_p1 }
  0x11   :  { %67 = vrot.lane.b32.xlu1 %v60_v35, %s337_s13  ;;  %63 = vrot.lane.b32.xlu0 %v55_v36, %s337_s13 }
  0x12   :  { %282 = vmatpush3.bf16.msra.mxu0 %v279_v32  ;;  %303 = vmatpush3.bf16.msra.mxu1 %v279_v32  ;;  %p320_p4 = pnand %p319_p3, %p313_p0 }
  0x13   :  { %284 = vmatprep.subr.bf16.mxu0 %v283_v37  ;;  %298 = vmatprep.subr.bf16.mxu1 %v283_v37 }
  0x16   :  { %286 = vmatpush3.bf16.msra.mxu0 %v283_v37  ;;  %304 = vmatpush3.bf16.msra.mxu1 %v283_v37 }
  0x17   :  { %288 = vmatprep.subr.bf16.mxu0 %v287_v40  ;;  %299 = vmatprep.subr.bf16.mxu1 %v287_v40 }
  0x1a   :  { %290 = vmatpush3.bf16.msra.mxu0 %v287_v40  ;;  %305 = vmatpush3.bf16.msra.mxu1 %v287_v40 }
  0x1b   :  { %292 = vmatprep.subr.bf16.mxu0 %v291_v43  ;;  %300 = vmatprep.subr.bf16.mxu1 %v291_v43 }
  0x1e   :  { %294 = vmatpush3.bf16.msra.mxu0 %v291_v43  ;;  %306 = vmatpush3.bf16.msra.mxu1 %v291_v43 }
  0x77   :  { %v41_v44 = vpop.permute.xlu1 %40  ;;  %v39_v45 = vpop.permute.xlu0 %38 }
  0x78   :  { %v74_v48 = vsel %vm73_vm2, %v372_v2, %v39_v45  ;;  %v75_v54 = vsel %vm73_vm2, %v364_v0, %v41_v44 }
  0x7b   :  { %v45_v46 = vpop.permute.xlu1 %44  ;;  %v43_v47 = vpop.permute.xlu0 %42 }
  0x7c   :  { %v76_v49 = vsel %vm73_vm2, %v388_v10, %v43_v47  ;;  %v77_v55 = vsel %vm73_vm2, %v379_v6, %v45_v46 }
  0x7f   :  { %v66_v50 = vpop.permute.xlu1 %65  ;;  %v62_v51 = vpop.permute.xlu0 %61 }
  0x80   :  { %v79_v52 = vsel %vm78_vm3, %v74_v48, %v62_v51  ;;  %v81_v53 = vsel %vm78_vm3, %v76_v49, %v66_v50 }
  0x81   :  { %265 = vmatprep.mubr.msk.f32.mxu0 %vm102_vm4, %v79_v52  ;;  %268 = vmatprep.mubr.msk.f32.mxu1 %vm102_vm4, %v81_v53 }
  0x83   :  { %v68_v56 = vpop.permute.xlu1 %67  ;;  %v64_v57 = vpop.permute.xlu0 %63 }
  0x84   :  { %v82_v58 = vsel %vm78_vm3, %v77_v55, %v68_v56  ;;  %v80_v59 = vsel %vm78_vm3, %v75_v54, %v64_v57 }
  0x85   :  { %266 = vmatmul.mubr.msk.f32.vlgmr.msra.gmra.mrb[0].mxu0 %vm102_vm4, %v80_v59  ;;  %269 = vmatmul.mubr.msk.f32.vlgmr.msra.gmra.mrb[0].mxu1 %vm102_vm4, %v82_v58 }
 0x158   :  { %v267_v61 = vpop.f32.mrb[0].mxu0  ;;  %v270_v62 = vpop.f32.mrb[0].mxu1 }
 0x159   :  { %v187_v63 = vadd.f32 %v267_v61, %v220_v60  ;;  %v197_v0 = vadd.f32 %v270_v62, %v220_v60  ;;  %v181_v1 = vpop.f32.mrb[1].mxu0  ;;  %v191_v2 = vpop.f32.mrb[1].mxu1 }
 0x15a   :  { %v182_v3 = vadd.f32 %v220_v60, %v181_v1  ;;  %v192_v4 = vadd.f32 %v220_v60, %v191_v2 }
 0x15b   :  { %201 = vst.msk [vmem:[#allocation2 + $0x8] sm:$0xff] %vm78_vm3, %v187_v63  ;;  %203 = vst.msk [vmem:[#allocation2 + $0x18] sm:$0xff] %vm78_vm3, %v197_v0 }
 0x15c   :  { %200 = vst.msk [vmem:[#allocation2] sm:$0xff] %vm78_vm3, %v182_v3  ;;  %202 = vst.msk [vmem:[#allocation2 + $0x10] sm:$0xff] %vm78_vm3, %v192_v4 }
 0x15d   :  { %323 = shalt.err (!%p320_p4)
}
 0x15e   :  { %s324_s27 = scalar_lea.hbm %s473_s3, 512 }
 0x15f   :  { %p325_p5 = scmp.ne.s32.totalorder %s473_s3, %s324_s27  ;;  %p328_p6 = scmp.lt.u32.totalorder %s324_s27, %s473_s3 }
 0x161   :  { %p330_p7 = pnand %p328_p6, %p325_p5 }
 0x163   :  { %333 = shalt.err (!%p330_p7)
}
 0x164   :  { %s339_s4 = smov 128   ;;  %s340_s5 = smov 8  }
 0x165   :  { %215 = dma.vmem_to_hbm [thread:$0]  %s210_s24, 512, %s473_s3, [#allocation3], %s339_s4, %s339_s4, %s340_s5  }
 0x166   :  { %334 = dma.done.wait [#allocation3], 512  }
 0x167   :  { %335 = vsyncadd [#allocation3], 4294966784 }
 0x168   :  { %219 = vsyncpa [#allocation3], 1 }

</bundles_post_ra>
